<compile_context>
chip_gen: v7x
topology: tpu7x:2x2x1
jax: 0.10.0
libtpu: 0.0.40
codegen_flags: <defaults>
</compile_context>

<pallas_src>
import jax
import jax.numpy as jnp
from jax.experimental import pallas as pl
from jax.experimental.pallas import tpu as pltpu


def _pos_embedding_kernel(pos_ref, table_hbm, w_ref, b_ref, out_ref, emb_ref, sem):
    """Single grid step: DMA-gather N=B*S rows from the HBM table, one matmul.

    pos_ref:   SMEM [N] int32              (scalar prefetch)
    table_hbm: HBM  [in_dim, out_dim] f32  (memory_space=pl.ANY, no auto-DMA)
    w_ref:     VMEM [out_dim, out_dim] f32 (holds W^T)
    b_ref:     VMEM [1, out_dim] f32
    out_ref:   VMEM [N, out_dim] f32
    emb_ref:   VMEM scratch [N, out_dim] f32
    sem:       DMA semaphores, shape (N,)
    """
    n_rows = emb_ref.shape[0]
    in_dim = table_hbm.shape[0]

    # Issue all row-gather DMAs first so they overlap, then wait on all.
    copies = []
    for s in range(n_rows):  # N is small & static -> unrolled at trace time
        idx = jnp.clip(pos_ref[s], 0, in_dim - 1)  # guard out-of-range positions
        cp = pltpu.make_async_copy(table_hbm.at[idx], emb_ref.at[s], sem.at[s])
        cp.start()
        copies.append(cp)
    for cp in copies:
        cp.wait()

    # Linear layer on the MXU: x @ W^T + b  (w_ref already holds W^T).
    out = jnp.dot(emb_ref[...], w_ref[...], preferred_element_type=jnp.float32)
    out_ref[...] = out + b_ref[...]


def position_embedding_forward(positions, table, w_t, bias):
    """positions: [B,S] int; table: [in_dim,out_dim] f32; w_t = W.T; bias: [out_dim]."""
    B, S = positions.shape
    in_dim, out_dim = table.shape
    N = B * S
    pos_flat = positions.reshape(N).astype(jnp.int32)
    bias2d = bias.reshape(1, out_dim)

    grid_spec = pltpu.PrefetchScalarGridSpec(
        num_scalar_prefetch=1,                 # flattened positions -> SMEM
        grid=(1,),                             # single step: one matmul, one store
        in_specs=[
            pl.BlockSpec(memory_space=pl.ANY),                         # table in HBM
            pl.BlockSpec((out_dim, out_dim), lambda i, pos: (0, 0)),   # W^T
            pl.BlockSpec((1, out_dim), lambda i, pos: (0, 0)),         # bias
        ],
        out_specs=pl.BlockSpec((N, out_dim), lambda i, pos: (0, 0)),
        scratch_shapes=[
            pltpu.VMEM((N, out_dim), jnp.float32),   # gathered embedding rows
            pltpu.SemaphoreType.DMA((N,)),           # one DMA sem per gathered row
        ],
    )

    itemsize = 4
    cost = pl.CostEstimate(
        flops=2 * N * out_dim * out_dim,
        transcendentals=0,
        bytes_accessed=(N * out_dim            # gathered rows
                        + out_dim * out_dim    # W^T
                        + out_dim              # bias
                        + N * out_dim) * itemsize,  # output
    )

    fn = pl.pallas_call(
        _pos_embedding_kernel,
        out_shape=jax.ShapeDtypeStruct((N, out_dim), jnp.float32),
        grid_spec=grid_spec,
        compiler_params=pltpu.CompilerParams(dimension_semantics=("parallel",)),
        cost_estimate=cost,
    )
    out2d = fn(pos_flat, table, w_t, bias2d)
    return out2d.reshape(B, S, out_dim)


def build_pos_emb_table(max_pos=5120, out_dim=64):
    """Matches the PyTorch __init__ construction of self.pos_emb exactly."""
    in_dim = max_pos + 1
    positions = jnp.arange(in_dim, dtype=jnp.float32)
    inv_freq = 1.0 / (10000.0 ** (jnp.arange(0.0, out_dim, 2.0, dtype=jnp.float32) / out_dim))
    sinusoid_inp = positions[:, None] * inv_freq[None, :]          # [in_dim, out_dim//2]
    table = jnp.zeros((in_dim, out_dim), dtype=jnp.float32)
    table = table.at[:, 1::2].set(jnp.sin(sinusoid_inp))           # odd cols  = sin
    table = table.at[:, 0::2].set(jnp.cos(sinusoid_inp))           # even cols = cos
    return table


if __name__ == "__main__":
    MAX_POS = 5120
    OUT_DIM = 64
    B, S = 2, 8

    key = jax.random.PRNGKey(0)
    k_w, k_b, k_p = jax.random.split(key, 3)

    # Deterministic synthetic params for nn.Linear(out_dim, out_dim).
    # PyTorch weight shape is [out, in]; forward is x @ W.T + b.
    W = jax.random.normal(k_w, (OUT_DIM, OUT_DIM), dtype=jnp.float32) * 0.02
    bias = jax.random.normal(k_b, (OUT_DIM,), dtype=jnp.float32) * 0.01

    table = build_pos_emb_table(MAX_POS, OUT_DIM)

    # positions is a LongTensor in PyTorch; use int32 indices in [0, max_pos].
    positions = jax.random.randint(k_p, (B, S), 0, MAX_POS + 1, dtype=jnp.int32)

    out = position_embedding_forward(positions, table, W.T, bias)
    out = jax.block_until_ready(out)

    # Pure-JAX reference for correctness.
    ref = table[positions] @ W.T + bias
    assert out.shape == (B, S, OUT_DIM)
    assert jnp.allclose(out, ref, atol=1e-5, rtol=1e-5), "mismatch vs reference"

    print("KERNEL_OK")
</pallas_src>

<mosaic_0001>
module attributes {stable_mosaic.version = 11 : i64} {
  func.func @_pos_embedding_kernel(%arg0: i32, %arg1: memref<16xi32, #tpu.memory_space<smem>>, %arg2: memref<5121x64xf32, #tpu.memory_space<any>>, %arg3: memref<64x64xf32, #tpu.memory_space<vmem>>, %arg4: memref<1x64xf32, #tpu.memory_space<vmem>>, %arg5: memref<16x64xf32, #tpu.memory_space<vmem>>, %arg6: memref<16x64xf32, #tpu.memory_space<vmem>>, %arg7: memref<16x!tpu.dma_semaphore, #tpu.memory_space<semaphore_mem>>) attributes {dimension_semantics = [#tpu.dimension_semantics<parallel>], iteration_bounds = array<i64: 1>, scalar_prefetch = 1 : i64, scratch_operands = 2 : i64, tpu.core_type = #tpu.core_type<tc>, window_params = [{}, {pipeline_mode = #tpu.pipeline_mode<synchronous>, transform_indices = @transform_1, window_bounds = array<i64: 64, 64>}, {pipeline_mode = #tpu.pipeline_mode<synchronous>, transform_indices = @transform_2, window_bounds = array<i64: 1, 64>}, {pipeline_mode = #tpu.pipeline_mode<synchronous>, transform_indices = @transform_3, window_bounds = array<i64: 16, 64>}]} {
    %c0 = arith.constant 0 : index
    %0 = memref.load %arg1[%c0] : memref<16xi32, #tpu.memory_space<smem>>
    %c0_i32 = arith.constant 0 : i32
    %c5120_i32 = arith.constant 5120 : i32
    %1 = arith.maxsi %c0_i32, %0 : i32
    %2 = arith.minsi %c5120_i32, %1 : i32
    %c0_i32_0 = arith.constant 0 : i32
    %c0_i32_1 = arith.constant 0 : i32
    %c0_i32_2 = arith.constant 0 : i32
    %3 = tpu.memref_slice %arg2[%2, %c0_i32_2] : memref<5121x64xf32, #tpu.memory_space<any>> -> memref<1x64xf32, #tpu.memory_space<any>>
    %4 = tpu.memref_squeeze %3 : memref<1x64xf32, #tpu.memory_space<any>> -> memref<64xf32, #tpu.memory_space<any>>
    %c0_i32_3 = arith.constant 0 : i32
    %5 = tpu.memref_slice %arg6[%c0_i32_0, %c0_i32_3] : memref<16x64xf32, #tpu.memory_space<vmem>> -> memref<1x64xf32, #tpu.memory_space<vmem>>
    %6 = tpu.memref_squeeze %5 : memref<1x64xf32, #tpu.memory_space<vmem>> -> memref<64xf32, #tpu.memory_space<vmem>>
    %7 = tpu.memref_slice %arg7[%c0_i32_1] : memref<16x!tpu.dma_semaphore, #tpu.memory_space<semaphore_mem>> -> memref<1x!tpu.dma_semaphore, #tpu.memory_space<semaphore_mem>>
    %8 = tpu.memref_squeeze %7 : memref<1x!tpu.dma_semaphore, #tpu.memory_space<semaphore_mem>> -> memref<!tpu.dma_semaphore, #tpu.memory_space<semaphore_mem>>
    tpu.enqueue_dma source(%4 : memref<64xf32, #tpu.memory_space<any>>) target(%6 : memref<64xf32, #tpu.memory_space<vmem>>) target_semaphore(%8 : memref<!tpu.dma_semaphore, #tpu.memory_space<semaphore_mem>>)
    %c1 = arith.constant 1 : index
    %9 = memref.load %arg1[%c1] : memref<16xi32, #tpu.memory_space<smem>>
    %c0_i32_4 = arith.constant 0 : i32
    %c5120_i32_5 = arith.constant 5120 : i32
    %10 = arith.maxsi %c0_i32_4, %9 : i32
    %11 = arith.minsi %c5120_i32_5, %10 : i32
    %c1_i32 = arith.constant 1 : i32
    %c1_i32_6 = arith.constant 1 : i32
    %c0_i32_7 = arith.constant 0 : i32
    %12 = tpu.memref_slice %arg2[%11, %c0_i32_7] : memref<5121x64xf32, #tpu.memory_space<any>> -> memref<1x64xf32, #tpu.memory_space<any>>
    %13 = tpu.memref_squeeze %12 : memref<1x64xf32, #tpu.memory_space<any>> -> memref<64xf32, #tpu.memory_space<any>>
    %c0_i32_8 = arith.constant 0 : i32
    %14 = tpu.memref_slice %arg6[%c1_i32, %c0_i32_8] : memref<16x64xf32, #tpu.memory_space<vmem>> -> memref<1x64xf32, #tpu.memory_space<vmem>>
    %15 = tpu.memref_squeeze %14 : memref<1x64xf32, #tpu.memory_space<vmem>> -> memref<64xf32, #tpu.memory_space<vmem>>
    %16 = tpu.memref_slice %arg7[%c1_i32_6] : memref<16x!tpu.dma_semaphore, #tpu.memory_space<semaphore_mem>> -> memref<1x!tpu.dma_semaphore, #tpu.memory_space<semaphore_mem>>
    %17 = tpu.memref_squeeze %16 : memref<1x!tpu.dma_semaphore, #tpu.memory_space<semaphore_mem>> -> memref<!tpu.dma_semaphore, #tpu.memory_space<semaphore_mem>>
    tpu.enqueue_dma source(%13 : memref<64xf32, #tpu.memory_space<any>>) target(%15 : memref<64xf32, #tpu.memory_space<vmem>>) target_semaphore(%17 : memref<!tpu.dma_semaphore, #tpu.memory_space<semaphore_mem>>)
    %c2 = arith.constant 2 : index
    %18 = memref.load %arg1[%c2] : memref<16xi32, #tpu.memory_space<smem>>
    %c0_i32_9 = arith.constant 0 : i32
    %c5120_i32_10 = arith.constant 5120 : i32
    %19 = arith.maxsi %c0_i32_9, %18 : i32
    %20 = arith.minsi %c5120_i32_10, %19 : i32
    %c2_i32 = arith.constant 2 : i32
    %c2_i32_11 = arith.constant 2 : i32
    %c0_i32_12 = arith.constant 0 : i32
    %21 = tpu.memref_slice %arg2[%20, %c0_i32_12] : memref<5121x64xf32, #tpu.memory_space<any>> -> memref<1x64xf32, #tpu.memory_space<any>>
    %22 = tpu.memref_squeeze %21 : memref<1x64xf32, #tpu.memory_space<any>> -> memref<64xf32, #tpu.memory_space<any>>
    %c0_i32_13 = arith.constant 0 : i32
    %23 = tpu.memref_slice %arg6[%c2_i32, %c0_i32_13] : memref<16x64xf32, #tpu.memory_space<vmem>> -> memref<1x64xf32, #tpu.memory_space<vmem>>
    %24 = tpu.memref_squeeze %23 : memref<1x64xf32, #tpu.memory_space<vmem>> -> memref<64xf32, #tpu.memory_space<vmem>>
    %25 = tpu.memref_slice %arg7[%c2_i32_11] : memref<16x!tpu.dma_semaphore, #tpu.memory_space<semaphore_mem>> -> memref<1x!tpu.dma_semaphore, #tpu.memory_space<semaphore_mem>>
    %26 = tpu.memref_squeeze %25 : memref<1x!tpu.dma_semaphore, #tpu.memory_space<semaphore_mem>> -> memref<!tpu.dma_semaphore, #tpu.memory_space<semaphore_mem>>
    tpu.enqueue_dma source(%22 : memref<64xf32, #tpu.memory_space<any>>) target(%24 : memref<64xf32, #tpu.memory_space<vmem>>) target_semaphore(%26 : memref<!tpu.dma_semaphore, #tpu.memory_space<semaphore_mem>>)
    %c3 = arith.constant 3 : index
    %27 = memref.load %arg1[%c3] : memref<16xi32, #tpu.memory_space<smem>>
    %c0_i32_14 = arith.constant 0 : i32
    %c5120_i32_15 = arith.constant 5120 : i32
    %28 = arith.maxsi %c0_i32_14, %27 : i32
    %29 = arith.minsi %c5120_i32_15, %28 : i32
    %c3_i32 = arith.constant 3 : i32
    %c3_i32_16 = arith.constant 3 : i32
    %c0_i32_17 = arith.constant 0 : i32
    %30 = tpu.memref_slice %arg2[%29, %c0_i32_17] : memref<5121x64xf32, #tpu.memory_space<any>> -> memref<1x64xf32, #tpu.memory_space<any>>
    %31 = tpu.memref_squeeze %30 : memref<1x64xf32, #tpu.memory_space<any>> -> memref<64xf32, #tpu.memory_space<any>>
    %c0_i32_18 = arith.constant 0 : i32
    %32 = tpu.memref_slice %arg6[%c3_i32, %c0_i32_18] : memref<16x64xf32, #tpu.memory_space<vmem>> -> memref<1x64xf32, #tpu.memory_space<vmem>>
    %33 = tpu.memref_squeeze %32 : memref<1x64xf32, #tpu.memory_space<vmem>> -> memref<64xf32, #tpu.memory_space<vmem>>
    %34 = tpu.memref_slice %arg7[%c3_i32_16] : memref<16x!tpu.dma_semaphore, #tpu.memory_space<semaphore_mem>> -> memref<1x!tpu.dma_semaphore, #tpu.memory_space<semaphore_mem>>
    %35 = tpu.memref_squeeze %34 : memref<1x!tpu.dma_semaphore, #tpu.memory_space<semaphore_mem>> -> memref<!tpu.dma_semaphore, #tpu.memory_space<semaphore_mem>>
    tpu.enqueue_dma source(%31 : memref<64xf32, #tpu.memory_space<any>>) target(%33 : memref<64xf32, #tpu.memory_space<vmem>>) target_semaphore(%35 : memref<!tpu.dma_semaphore, #tpu.memory_space<semaphore_mem>>)
    %c4 = arith.constant 4 : index
    %36 = memref.load %arg1[%c4] : memref<16xi32, #tpu.memory_space<smem>>
    %c0_i32_19 = arith.constant 0 : i32
    %c5120_i32_20 = arith.constant 5120 : i32
    %37 = arith.maxsi %c0_i32_19, %36 : i32
    %38 = arith.minsi %c5120_i32_20, %37 : i32
    %c4_i32 = arith.constant 4 : i32
    %c4_i32_21 = arith.constant 4 : i32
    %c0_i32_22 = arith.constant 0 : i32
    %39 = tpu.memref_slice %arg2[%38, %c0_i32_22] : memref<5121x64xf32, #tpu.memory_space<any>> -> memref<1x64xf32, #tpu.memory_space<any>>
    %40 = tpu.memref_squeeze %39 : memref<1x64xf32, #tpu.memory_space<any>> -> memref<64xf32, #tpu.memory_space<any>>
    %c0_i32_23 = arith.constant 0 : i32
    %41 = tpu.memref_slice %arg6[%c4_i32, %c0_i32_23] : memref<16x64xf32, #tpu.memory_space<vmem>> -> memref<1x64xf32, #tpu.memory_space<vmem>>
    %42 = tpu.memref_squeeze %41 : memref<1x64xf32, #tpu.memory_space<vmem>> -> memref<64xf32, #tpu.memory_space<vmem>>
    %43 = tpu.memref_slice %arg7[%c4_i32_21] : memref<16x!tpu.dma_semaphore, #tpu.memory_space<semaphore_mem>> -> memref<1x!tpu.dma_semaphore, #tpu.memory_space<semaphore_mem>>
    %44 = tpu.memref_squeeze %43 : memref<1x!tpu.dma_semaphore, #tpu.memory_space<semaphore_mem>> -> memref<!tpu.dma_semaphore, #tpu.memory_space<semaphore_mem>>
    tpu.enqueue_dma source(%40 : memref<64xf32, #tpu.memory_space<any>>) target(%42 : memref<64xf32, #tpu.memory_space<vmem>>) target_semaphore(%44 : memref<!tpu.dma_semaphore, #tpu.memory_space<semaphore_mem>>)
    %c5 = arith.constant 5 : index
    %45 = memref.load %arg1[%c5] : memref<16xi32, #tpu.memory_space<smem>>
    %c0_i32_24 = arith.constant 0 : i32
    %c5120_i32_25 = arith.constant 5120 : i32
    %46 = arith.maxsi %c0_i32_24, %45 : i32
    %47 = arith.minsi %c5120_i32_25, %46 : i32
    %c5_i32 = arith.constant 5 : i32
    %c5_i32_26 = arith.constant 5 : i32
    %c0_i32_27 = arith.constant 0 : i32
    %48 = tpu.memref_slice %arg2[%47, %c0_i32_27] : memref<5121x64xf32, #tpu.memory_space<any>> -> memref<1x64xf32, #tpu.memory_space<any>>
    %49 = tpu.memref_squeeze %48 : memref<1x64xf32, #tpu.memory_space<any>> -> memref<64xf32, #tpu.memory_space<any>>
    %c0_i32_28 = arith.constant 0 : i32
    %50 = tpu.memref_slice %arg6[%c5_i32, %c0_i32_28] : memref<16x64xf32, #tpu.memory_space<vmem>> -> memref<1x64xf32, #tpu.memory_space<vmem>>
    %51 = tpu.memref_squeeze %50 : memref<1x64xf32, #tpu.memory_space<vmem>> -> memref<64xf32, #tpu.memory_space<vmem>>
    %52 = tpu.memref_slice %arg7[%c5_i32_26] : memref<16x!tpu.dma_semaphore, #tpu.memory_space<semaphore_mem>> -> memref<1x!tpu.dma_semaphore, #tpu.memory_space<semaphore_mem>>
    %53 = tpu.memref_squeeze %52 : memref<1x!tpu.dma_semaphore, #tpu.memory_space<semaphore_mem>> -> memref<!tpu.dma_semaphore, #tpu.memory_space<semaphore_mem>>
    tpu.enqueue_dma source(%49 : memref<64xf32, #tpu.memory_space<any>>) target(%51 : memref<64xf32, #tpu.memory_space<vmem>>) target_semaphore(%53 : memref<!tpu.dma_semaphore, #tpu.memory_space<semaphore_mem>>)
    %c6 = arith.constant 6 : index
    %54 = memref.load %arg1[%c6] : memref<16xi32, #tpu.memory_space<smem>>
    %c0_i32_29 = arith.constant 0 : i32
    %c5120_i32_30 = arith.constant 5120 : i32
    %55 = arith.maxsi %c0_i32_29, %54 : i32
    %56 = arith.minsi %c5120_i32_30, %55 : i32
    %c6_i32 = arith.constant 6 : i32
    %c6_i32_31 = arith.constant 6 : i32
    %c0_i32_32 = arith.constant 0 : i32
    %57 = tpu.memref_slice %arg2[%56, %c0_i32_32] : memref<5121x64xf32, #tpu.memory_space<any>> -> memref<1x64xf32, #tpu.memory_space<any>>
    %58 = tpu.memref_squeeze %57 : memref<1x64xf32, #tpu.memory_space<any>> -> memref<64xf32, #tpu.memory_space<any>>
    %c0_i32_33 = arith.constant 0 : i32
    %59 = tpu.memref_slice %arg6[%c6_i32, %c0_i32_33] : memref<16x64xf32, #tpu.memory_space<vmem>> -> memref<1x64xf32, #tpu.memory_space<vmem>>
    %60 = tpu.memref_squeeze %59 : memref<1x64xf32, #tpu.memory_space<vmem>> -> memref<64xf32, #tpu.memory_space<vmem>>
    %61 = tpu.memref_slice %arg7[%c6_i32_31] : memref<16x!tpu.dma_semaphore, #tpu.memory_space<semaphore_mem>> -> memref<1x!tpu.dma_semaphore, #tpu.memory_space<semaphore_mem>>
    %62 = tpu.memref_squeeze %61 : memref<1x!tpu.dma_semaphore, #tpu.memory_space<semaphore_mem>> -> memref<!tpu.dma_semaphore, #tpu.memory_space<semaphore_mem>>
    tpu.enqueue_dma source(%58 : memref<64xf32, #tpu.memory_space<any>>) target(%60 : memref<64xf32, #tpu.memory_space<vmem>>) target_semaphore(%62 : memref<!tpu.dma_semaphore, #tpu.memory_space<semaphore_mem>>)
    %c7 = arith.constant 7 : index
    %63 = memref.load %arg1[%c7] : memref<16xi32, #tpu.memory_space<smem>>
    %c0_i32_34 = arith.constant 0 : i32
    %c5120_i32_35 = arith.constant 5120 : i32
    %64 = arith.maxsi %c0_i32_34, %63 : i32
    %65 = arith.minsi %c5120_i32_35, %64 : i32
    %c7_i32 = arith.constant 7 : i32
    %c7_i32_36 = arith.constant 7 : i32
    %c0_i32_37 = arith.constant 0 : i32
    %66 = tpu.memref_slice %arg2[%65, %c0_i32_37] : memref<5121x64xf32, #tpu.memory_space<any>> -> memref<1x64xf32, #tpu.memory_space<any>>
    %67 = tpu.memref_squeeze %66 : memref<1x64xf32, #tpu.memory_space<any>> -> memref<64xf32, #tpu.memory_space<any>>
    %c0_i32_38 = arith.constant 0 : i32
    %68 = tpu.memref_slice %arg6[%c7_i32, %c0_i32_38] : memref<16x64xf32, #tpu.memory_space<vmem>> -> memref<1x64xf32, #tpu.memory_space<vmem>>
    %69 = tpu.memref_squeeze %68 : memref<1x64xf32, #tpu.memory_space<vmem>> -> memref<64xf32, #tpu.memory_space<vmem>>
    %70 = tpu.memref_slice %arg7[%c7_i32_36] : memref<16x!tpu.dma_semaphore, #tpu.memory_space<semaphore_mem>> -> memref<1x!tpu.dma_semaphore, #tpu.memory_space<semaphore_mem>>
    %71 = tpu.memref_squeeze %70 : memref<1x!tpu.dma_semaphore, #tpu.memory_space<semaphore_mem>> -> memref<!tpu.dma_semaphore, #tpu.memory_space<semaphore_mem>>
    tpu.enqueue_dma source(%67 : memref<64xf32, #tpu.memory_space<any>>) target(%69 : memref<64xf32, #tpu.memory_space<vmem>>) target_semaphore(%71 : memref<!tpu.dma_semaphore, #tpu.memory_space<semaphore_mem>>)
    %c8 = arith.constant 8 : index
    %72 = memref.load %arg1[%c8] : memref<16xi32, #tpu.memory_space<smem>>
    %c0_i32_39 = arith.constant 0 : i32
    %c5120_i32_40 = arith.constant 5120 : i32
    %73 = arith.maxsi %c0_i32_39, %72 : i32
    %74 = arith.minsi %c5120_i32_40, %73 : i32
    %c8_i32 = arith.constant 8 : i32
    %c8_i32_41 = arith.constant 8 : i32
    %c0_i32_42 = arith.constant 0 : i32
    %75 = tpu.memref_slice %arg2[%74, %c0_i32_42] : memref<5121x64xf32, #tpu.memory_space<any>> -> memref<1x64xf32, #tpu.memory_space<any>>
    %76 = tpu.memref_squeeze %75 : memref<1x64xf32, #tpu.memory_space<any>> -> memref<64xf32, #tpu.memory_space<any>>
    %c0_i32_43 = arith.constant 0 : i32
    %77 = tpu.memref_slice %arg6[%c8_i32, %c0_i32_43] : memref<16x64xf32, #tpu.memory_space<vmem>> -> memref<1x64xf32, #tpu.memory_space<vmem>>
    %78 = tpu.memref_squeeze %77 : memref<1x64xf32, #tpu.memory_space<vmem>> -> memref<64xf32, #tpu.memory_space<vmem>>
    %79 = tpu.memref_slice %arg7[%c8_i32_41] : memref<16x!tpu.dma_semaphore, #tpu.memory_space<semaphore_mem>> -> memref<1x!tpu.dma_semaphore, #tpu.memory_space<semaphore_mem>>
    %80 = tpu.memref_squeeze %79 : memref<1x!tpu.dma_semaphore, #tpu.memory_space<semaphore_mem>> -> memref<!tpu.dma_semaphore, #tpu.memory_space<semaphore_mem>>
    tpu.enqueue_dma source(%76 : memref<64xf32, #tpu.memory_space<any>>) target(%78 : memref<64xf32, #tpu.memory_space<vmem>>) target_semaphore(%80 : memref<!tpu.dma_semaphore, #tpu.memory_space<semaphore_mem>>)
    %c9 = arith.constant 9 : index
    %81 = memref.load %arg1[%c9] : memref<16xi32, #tpu.memory_space<smem>>
    %c0_i32_44 = arith.constant 0 : i32
    %c5120_i32_45 = arith.constant 5120 : i32
    %82 = arith.maxsi %c0_i32_44, %81 : i32
    %83 = arith.minsi %c5120_i32_45, %82 : i32
    %c9_i32 = arith.constant 9 : i32
    %c9_i32_46 = arith.constant 9 : i32
    %c0_i32_47 = arith.constant 0 : i32
    %84 = tpu.memref_slice %arg2[%83, %c0_i32_47] : memref<5121x64xf32, #tpu.memory_space<any>> -> memref<1x64xf32, #tpu.memory_space<any>>
    %85 = tpu.memref_squeeze %84 : memref<1x64xf32, #tpu.memory_space<any>> -> memref<64xf32, #tpu.memory_space<any>>
    %c0_i32_48 = arith.constant 0 : i32
    %86 = tpu.memref_slice %arg6[%c9_i32, %c0_i32_48] : memref<16x64xf32, #tpu.memory_space<vmem>> -> memref<1x64xf32, #tpu.memory_space<vmem>>
    %87 = tpu.memref_squeeze %86 : memref<1x64xf32, #tpu.memory_space<vmem>> -> memref<64xf32, #tpu.memory_space<vmem>>
    %88 = tpu.memref_slice %arg7[%c9_i32_46] : memref<16x!tpu.dma_semaphore, #tpu.memory_space<semaphore_mem>> -> memref<1x!tpu.dma_semaphore, #tpu.memory_space<semaphore_mem>>
    %89 = tpu.memref_squeeze %88 : memref<1x!tpu.dma_semaphore, #tpu.memory_space<semaphore_mem>> -> memref<!tpu.dma_semaphore, #tpu.memory_space<semaphore_mem>>
    tpu.enqueue_dma source(%85 : memref<64xf32, #tpu.memory_space<any>>) target(%87 : memref<64xf32, #tpu.memory_space<vmem>>) target_semaphore(%89 : memref<!tpu.dma_semaphore, #tpu.memory_space<semaphore_mem>>)
    %c10 = arith.constant 10 : index
    %90 = memref.load %arg1[%c10] : memref<16xi32, #tpu.memory_space<smem>>
    %c0_i32_49 = arith.constant 0 : i32
    %c5120_i32_50 = arith.constant 5120 : i32
    %91 = arith.maxsi %c0_i32_49, %90 : i32
    %92 = arith.minsi %c5120_i32_50, %91 : i32
    %c10_i32 = arith.constant 10 : i32
    %c10_i32_51 = arith.constant 10 : i32
    %c0_i32_52 = arith.constant 0 : i32
    %93 = tpu.memref_slice %arg2[%92, %c0_i32_52] : memref<5121x64xf32, #tpu.memory_space<any>> -> memref<1x64xf32, #tpu.memory_space<any>>
    %94 = tpu.memref_squeeze %93 : memref<1x64xf32, #tpu.memory_space<any>> -> memref<64xf32, #tpu.memory_space<any>>
    %c0_i32_53 = arith.constant 0 : i32
    %95 = tpu.memref_slice %arg6[%c10_i32, %c0_i32_53] : memref<16x64xf32, #tpu.memory_space<vmem>> -> memref<1x64xf32, #tpu.memory_space<vmem>>
    %96 = tpu.memref_squeeze %95 : memref<1x64xf32, #tpu.memory_space<vmem>> -> memref<64xf32, #tpu.memory_space<vmem>>
    %97 = tpu.memref_slice %arg7[%c10_i32_51] : memref<16x!tpu.dma_semaphore, #tpu.memory_space<semaphore_mem>> -> memref<1x!tpu.dma_semaphore, #tpu.memory_space<semaphore_mem>>
    %98 = tpu.memref_squeeze %97 : memref<1x!tpu.dma_semaphore, #tpu.memory_space<semaphore_mem>> -> memref<!tpu.dma_semaphore, #tpu.memory_space<semaphore_mem>>
    tpu.enqueue_dma source(%94 : memref<64xf32, #tpu.memory_space<any>>) target(%96 : memref<64xf32, #tpu.memory_space<vmem>>) target_semaphore(%98 : memref<!tpu.dma_semaphore, #tpu.memory_space<semaphore_mem>>)
    %c11 = arith.constant 11 : index
    %99 = memref.load %arg1[%c11] : memref<16xi32, #tpu.memory_space<smem>>
    %c0_i32_54 = arith.constant 0 : i32
    %c5120_i32_55 = arith.constant 5120 : i32
    %100 = arith.maxsi %c0_i32_54, %99 : i32
    %101 = arith.minsi %c5120_i32_55, %100 : i32
    %c11_i32 = arith.constant 11 : i32
    %c11_i32_56 = arith.constant 11 : i32
    %c0_i32_57 = arith.constant 0 : i32
    %102 = tpu.memref_slice %arg2[%101, %c0_i32_57] : memref<5121x64xf32, #tpu.memory_space<any>> -> memref<1x64xf32, #tpu.memory_space<any>>
    %103 = tpu.memref_squeeze %102 : memref<1x64xf32, #tpu.memory_space<any>> -> memref<64xf32, #tpu.memory_space<any>>
    %c0_i32_58 = arith.constant 0 : i32
    %104 = tpu.memref_slice %arg6[%c11_i32, %c0_i32_58] : memref<16x64xf32, #tpu.memory_space<vmem>> -> memref<1x64xf32, #tpu.memory_space<vmem>>
    %105 = tpu.memref_squeeze %104 : memref<1x64xf32, #tpu.memory_space<vmem>> -> memref<64xf32, #tpu.memory_space<vmem>>
    %106 = tpu.memref_slice %arg7[%c11_i32_56] : memref<16x!tpu.dma_semaphore, #tpu.memory_space<semaphore_mem>> -> memref<1x!tpu.dma_semaphore, #tpu.memory_space<semaphore_mem>>
    %107 = tpu.memref_squeeze %106 : memref<1x!tpu.dma_semaphore, #tpu.memory_space<semaphore_mem>> -> memref<!tpu.dma_semaphore, #tpu.memory_space<semaphore_mem>>
    tpu.enqueue_dma source(%103 : memref<64xf32, #tpu.memory_space<any>>) target(%105 : memref<64xf32, #tpu.memory_space<vmem>>) target_semaphore(%107 : memref<!tpu.dma_semaphore, #tpu.memory_space<semaphore_mem>>)
    %c12 = arith.constant 12 : index
    %108 = memref.load %arg1[%c12] : memref<16xi32, #tpu.memory_space<smem>>
    %c0_i32_59 = arith.constant 0 : i32
    %c5120_i32_60 = arith.constant 5120 : i32
    %109 = arith.maxsi %c0_i32_59, %108 : i32
    %110 = arith.minsi %c5120_i32_60, %109 : i32
    %c12_i32 = arith.constant 12 : i32
    %c12_i32_61 = arith.constant 12 : i32
    %c0_i32_62 = arith.constant 0 : i32
    %111 = tpu.memref_slice %arg2[%110, %c0_i32_62] : memref<5121x64xf32, #tpu.memory_space<any>> -> memref<1x64xf32, #tpu.memory_space<any>>
    %112 = tpu.memref_squeeze %111 : memref<1x64xf32, #tpu.memory_space<any>> -> memref<64xf32, #tpu.memory_space<any>>
    %c0_i32_63 = arith.constant 0 : i32
    %113 = tpu.memref_slice %arg6[%c12_i32, %c0_i32_63] : memref<16x64xf32, #tpu.memory_space<vmem>> -> memref<1x64xf32, #tpu.memory_space<vmem>>
    %114 = tpu.memref_squeeze %113 : memref<1x64xf32, #tpu.memory_space<vmem>> -> memref<64xf32, #tpu.memory_space<vmem>>
    %115 = tpu.memref_slice %arg7[%c12_i32_61] : memref<16x!tpu.dma_semaphore, #tpu.memory_space<semaphore_mem>> -> memref<1x!tpu.dma_semaphore, #tpu.memory_space<semaphore_mem>>
    %116 = tpu.memref_squeeze %115 : memref<1x!tpu.dma_semaphore, #tpu.memory_space<semaphore_mem>> -> memref<!tpu.dma_semaphore, #tpu.memory_space<semaphore_mem>>
    tpu.enqueue_dma source(%112 : memref<64xf32, #tpu.memory_space<any>>) target(%114 : memref<64xf32, #tpu.memory_space<vmem>>) target_semaphore(%116 : memref<!tpu.dma_semaphore, #tpu.memory_space<semaphore_mem>>)
    %c13 = arith.constant 13 : index
    %117 = memref.load %arg1[%c13] : memref<16xi32, #tpu.memory_space<smem>>
    %c0_i32_64 = arith.constant 0 : i32
    %c5120_i32_65 = arith.constant 5120 : i32
    %118 = arith.maxsi %c0_i32_64, %117 : i32
    %119 = arith.minsi %c5120_i32_65, %118 : i32
    %c13_i32 = arith.constant 13 : i32
    %c13_i32_66 = arith.constant 13 : i32
    %c0_i32_67 = arith.constant 0 : i32
    %120 = tpu.memref_slice %arg2[%119, %c0_i32_67] : memref<5121x64xf32, #tpu.memory_space<any>> -> memref<1x64xf32, #tpu.memory_space<any>>
    %121 = tpu.memref_squeeze %120 : memref<1x64xf32, #tpu.memory_space<any>> -> memref<64xf32, #tpu.memory_space<any>>
    %c0_i32_68 = arith.constant 0 : i32
    %122 = tpu.memref_slice %arg6[%c13_i32, %c0_i32_68] : memref<16x64xf32, #tpu.memory_space<vmem>> -> memref<1x64xf32, #tpu.memory_space<vmem>>
    %123 = tpu.memref_squeeze %122 : memref<1x64xf32, #tpu.memory_space<vmem>> -> memref<64xf32, #tpu.memory_space<vmem>>
    %124 = tpu.memref_slice %arg7[%c13_i32_66] : memref<16x!tpu.dma_semaphore, #tpu.memory_space<semaphore_mem>> -> memref<1x!tpu.dma_semaphore, #tpu.memory_space<semaphore_mem>>
    %125 = tpu.memref_squeeze %124 : memref<1x!tpu.dma_semaphore, #tpu.memory_space<semaphore_mem>> -> memref<!tpu.dma_semaphore, #tpu.memory_space<semaphore_mem>>
    tpu.enqueue_dma source(%121 : memref<64xf32, #tpu.memory_space<any>>) target(%123 : memref<64xf32, #tpu.memory_space<vmem>>) target_semaphore(%125 : memref<!tpu.dma_semaphore, #tpu.memory_space<semaphore_mem>>)
    %c14 = arith.constant 14 : index
    %126 = memref.load %arg1[%c14] : memref<16xi32, #tpu.memory_space<smem>>
    %c0_i32_69 = arith.constant 0 : i32
    %c5120_i32_70 = arith.constant 5120 : i32
    %127 = arith.maxsi %c0_i32_69, %126 : i32
    %128 = arith.minsi %c5120_i32_70, %127 : i32
    %c14_i32 = arith.constant 14 : i32
    %c14_i32_71 = arith.constant 14 : i32
    %c0_i32_72 = arith.constant 0 : i32
    %129 = tpu.memref_slice %arg2[%128, %c0_i32_72] : memref<5121x64xf32, #tpu.memory_space<any>> -> memref<1x64xf32, #tpu.memory_space<any>>
    %130 = tpu.memref_squeeze %129 : memref<1x64xf32, #tpu.memory_space<any>> -> memref<64xf32, #tpu.memory_space<any>>
    %c0_i32_73 = arith.constant 0 : i32
    %131 = tpu.memref_slice %arg6[%c14_i32, %c0_i32_73] : memref<16x64xf32, #tpu.memory_space<vmem>> -> memref<1x64xf32, #tpu.memory_space<vmem>>
    %132 = tpu.memref_squeeze %131 : memref<1x64xf32, #tpu.memory_space<vmem>> -> memref<64xf32, #tpu.memory_space<vmem>>
    %133 = tpu.memref_slice %arg7[%c14_i32_71] : memref<16x!tpu.dma_semaphore, #tpu.memory_space<semaphore_mem>> -> memref<1x!tpu.dma_semaphore, #tpu.memory_space<semaphore_mem>>
    %134 = tpu.memref_squeeze %133 : memref<1x!tpu.dma_semaphore, #tpu.memory_space<semaphore_mem>> -> memref<!tpu.dma_semaphore, #tpu.memory_space<semaphore_mem>>
    tpu.enqueue_dma source(%130 : memref<64xf32, #tpu.memory_space<any>>) target(%132 : memref<64xf32, #tpu.memory_space<vmem>>) target_semaphore(%134 : memref<!tpu.dma_semaphore, #tpu.memory_space<semaphore_mem>>)
    %c15 = arith.constant 15 : index
    %135 = memref.load %arg1[%c15] : memref<16xi32, #tpu.memory_space<smem>>
    %c0_i32_74 = arith.constant 0 : i32
    %c5120_i32_75 = arith.constant 5120 : i32
    %136 = arith.maxsi %c0_i32_74, %135 : i32
    %137 = arith.minsi %c5120_i32_75, %136 : i32
    %c15_i32 = arith.constant 15 : i32
    %c15_i32_76 = arith.constant 15 : i32
    %c0_i32_77 = arith.constant 0 : i32
    %138 = tpu.memref_slice %arg2[%137, %c0_i32_77] : memref<5121x64xf32, #tpu.memory_space<any>> -> memref<1x64xf32, #tpu.memory_space<any>>
    %139 = tpu.memref_squeeze %138 : memref<1x64xf32, #tpu.memory_space<any>> -> memref<64xf32, #tpu.memory_space<any>>
    %c0_i32_78 = arith.constant 0 : i32
    %140 = tpu.memref_slice %arg6[%c15_i32, %c0_i32_78] : memref<16x64xf32, #tpu.memory_space<vmem>> -> memref<1x64xf32, #tpu.memory_space<vmem>>
    %141 = tpu.memref_squeeze %140 : memref<1x64xf32, #tpu.memory_space<vmem>> -> memref<64xf32, #tpu.memory_space<vmem>>
    %142 = tpu.memref_slice %arg7[%c15_i32_76] : memref<16x!tpu.dma_semaphore, #tpu.memory_space<semaphore_mem>> -> memref<1x!tpu.dma_semaphore, #tpu.memory_space<semaphore_mem>>
    %143 = tpu.memref_squeeze %142 : memref<1x!tpu.dma_semaphore, #tpu.memory_space<semaphore_mem>> -> memref<!tpu.dma_semaphore, #tpu.memory_space<semaphore_mem>>
    tpu.enqueue_dma source(%139 : memref<64xf32, #tpu.memory_space<any>>) target(%141 : memref<64xf32, #tpu.memory_space<vmem>>) target_semaphore(%143 : memref<!tpu.dma_semaphore, #tpu.memory_space<semaphore_mem>>)
    %c0_i32_79 = arith.constant 0 : i32
    %c0_i32_80 = arith.constant 0 : i32
    %c0_i32_81 = arith.constant 0 : i32
    %144 = tpu.memref_slice %arg2[%2, %c0_i32_81] : memref<5121x64xf32, #tpu.memory_space<any>> -> memref<1x64xf32, #tpu.memory_space<any>>
    %145 = tpu.memref_squeeze %144 : memref<1x64xf32, #tpu.memory_space<any>> -> memref<64xf32, #tpu.memory_space<any>>
    %c0_i32_82 = arith.constant 0 : i32
    %146 = tpu.memref_slice %arg6[%c0_i32_79, %c0_i32_82] : memref<16x64xf32, #tpu.memory_space<vmem>> -> memref<1x64xf32, #tpu.memory_space<vmem>>
    %147 = tpu.memref_squeeze %146 : memref<1x64xf32, #tpu.memory_space<vmem>> -> memref<64xf32, #tpu.memory_space<vmem>>
    %148 = tpu.memref_slice %arg7[%c0_i32_80] : memref<16x!tpu.dma_semaphore, #tpu.memory_space<semaphore_mem>> -> memref<1x!tpu.dma_semaphore, #tpu.memory_space<semaphore_mem>>
    %149 = tpu.memref_squeeze %148 : memref<1x!tpu.dma_semaphore, #tpu.memory_space<semaphore_mem>> -> memref<!tpu.dma_semaphore, #tpu.memory_space<semaphore_mem>>
    tpu.wait_dma2 semaphore(%149 : memref<!tpu.dma_semaphore, #tpu.memory_space<semaphore_mem>>) src(%145 : memref<64xf32, #tpu.memory_space<any>>) dst(%147 : memref<64xf32, #tpu.memory_space<vmem>>)
    %c1_i32_83 = arith.constant 1 : i32
    %c1_i32_84 = arith.constant 1 : i32
    %c0_i32_85 = arith.constant 0 : i32
    %150 = tpu.memref_slice %arg2[%11, %c0_i32_85] : memref<5121x64xf32, #tpu.memory_space<any>> -> memref<1x64xf32, #tpu.memory_space<any>>
    %151 = tpu.memref_squeeze %150 : memref<1x64xf32, #tpu.memory_space<any>> -> memref<64xf32, #tpu.memory_space<any>>
    %c0_i32_86 = arith.constant 0 : i32
    %152 = tpu.memref_slice %arg6[%c1_i32_83, %c0_i32_86] : memref<16x64xf32, #tpu.memory_space<vmem>> -> memref<1x64xf32, #tpu.memory_space<vmem>>
    %153 = tpu.memref_squeeze %152 : memref<1x64xf32, #tpu.memory_space<vmem>> -> memref<64xf32, #tpu.memory_space<vmem>>
    %154 = tpu.memref_slice %arg7[%c1_i32_84] : memref<16x!tpu.dma_semaphore, #tpu.memory_space<semaphore_mem>> -> memref<1x!tpu.dma_semaphore, #tpu.memory_space<semaphore_mem>>
    %155 = tpu.memref_squeeze %154 : memref<1x!tpu.dma_semaphore, #tpu.memory_space<semaphore_mem>> -> memref<!tpu.dma_semaphore, #tpu.memory_space<semaphore_mem>>
    tpu.wait_dma2 semaphore(%155 : memref<!tpu.dma_semaphore, #tpu.memory_space<semaphore_mem>>) src(%151 : memref<64xf32, #tpu.memory_space<any>>) dst(%153 : memref<64xf32, #tpu.memory_space<vmem>>)
    %c2_i32_87 = arith.constant 2 : i32
    %c2_i32_88 = arith.constant 2 : i32
    %c0_i32_89 = arith.constant 0 : i32
    %156 = tpu.memref_slice %arg2[%20, %c0_i32_89] : memref<5121x64xf32, #tpu.memory_space<any>> -> memref<1x64xf32, #tpu.memory_space<any>>
    %157 = tpu.memref_squeeze %156 : memref<1x64xf32, #tpu.memory_space<any>> -> memref<64xf32, #tpu.memory_space<any>>
    %c0_i32_90 = arith.constant 0 : i32
    %158 = tpu.memref_slice %arg6[%c2_i32_87, %c0_i32_90] : memref<16x64xf32, #tpu.memory_space<vmem>> -> memref<1x64xf32, #tpu.memory_space<vmem>>
    %159 = tpu.memref_squeeze %158 : memref<1x64xf32, #tpu.memory_space<vmem>> -> memref<64xf32, #tpu.memory_space<vmem>>
    %160 = tpu.memref_slice %arg7[%c2_i32_88] : memref<16x!tpu.dma_semaphore, #tpu.memory_space<semaphore_mem>> -> memref<1x!tpu.dma_semaphore, #tpu.memory_space<semaphore_mem>>
    %161 = tpu.memref_squeeze %160 : memref<1x!tpu.dma_semaphore, #tpu.memory_space<semaphore_mem>> -> memref<!tpu.dma_semaphore, #tpu.memory_space<semaphore_mem>>
    tpu.wait_dma2 semaphore(%161 : memref<!tpu.dma_semaphore, #tpu.memory_space<semaphore_mem>>) src(%157 : memref<64xf32, #tpu.memory_space<any>>) dst(%159 : memref<64xf32, #tpu.memory_space<vmem>>)
    %c3_i32_91 = arith.constant 3 : i32
    %c3_i32_92 = arith.constant 3 : i32
    %c0_i32_93 = arith.constant 0 : i32
    %162 = tpu.memref_slice %arg2[%29, %c0_i32_93] : memref<5121x64xf32, #tpu.memory_space<any>> -> memref<1x64xf32, #tpu.memory_space<any>>
    %163 = tpu.memref_squeeze %162 : memref<1x64xf32, #tpu.memory_space<any>> -> memref<64xf32, #tpu.memory_space<any>>
    %c0_i32_94 = arith.constant 0 : i32
    %164 = tpu.memref_slice %arg6[%c3_i32_91, %c0_i32_94] : memref<16x64xf32, #tpu.memory_space<vmem>> -> memref<1x64xf32, #tpu.memory_space<vmem>>
    %165 = tpu.memref_squeeze %164 : memref<1x64xf32, #tpu.memory_space<vmem>> -> memref<64xf32, #tpu.memory_space<vmem>>
    %166 = tpu.memref_slice %arg7[%c3_i32_92] : memref<16x!tpu.dma_semaphore, #tpu.memory_space<semaphore_mem>> -> memref<1x!tpu.dma_semaphore, #tpu.memory_space<semaphore_mem>>
    %167 = tpu.memref_squeeze %166 : memref<1x!tpu.dma_semaphore, #tpu.memory_space<semaphore_mem>> -> memref<!tpu.dma_semaphore, #tpu.memory_space<semaphore_mem>>
    tpu.wait_dma2 semaphore(%167 : memref<!tpu.dma_semaphore, #tpu.memory_space<semaphore_mem>>) src(%163 : memref<64xf32, #tpu.memory_space<any>>) dst(%165 : memref<64xf32, #tpu.memory_space<vmem>>)
    %c4_i32_95 = arith.constant 4 : i32
    %c4_i32_96 = arith.constant 4 : i32
    %c0_i32_97 = arith.constant 0 : i32
    %168 = tpu.memref_slice %arg2[%38, %c0_i32_97] : memref<5121x64xf32, #tpu.memory_space<any>> -> memref<1x64xf32, #tpu.memory_space<any>>
    %169 = tpu.memref_squeeze %168 : memref<1x64xf32, #tpu.memory_space<any>> -> memref<64xf32, #tpu.memory_space<any>>
    %c0_i32_98 = arith.constant 0 : i32
    %170 = tpu.memref_slice %arg6[%c4_i32_95, %c0_i32_98] : memref<16x64xf32, #tpu.memory_space<vmem>> -> memref<1x64xf32, #tpu.memory_space<vmem>>
    %171 = tpu.memref_squeeze %170 : memref<1x64xf32, #tpu.memory_space<vmem>> -> memref<64xf32, #tpu.memory_space<vmem>>
    %172 = tpu.memref_slice %arg7[%c4_i32_96] : memref<16x!tpu.dma_semaphore, #tpu.memory_space<semaphore_mem>> -> memref<1x!tpu.dma_semaphore, #tpu.memory_space<semaphore_mem>>
    %173 = tpu.memref_squeeze %172 : memref<1x!tpu.dma_semaphore, #tpu.memory_space<semaphore_mem>> -> memref<!tpu.dma_semaphore, #tpu.memory_space<semaphore_mem>>
    tpu.wait_dma2 semaphore(%173 : memref<!tpu.dma_semaphore, #tpu.memory_space<semaphore_mem>>) src(%169 : memref<64xf32, #tpu.memory_space<any>>) dst(%171 : memref<64xf32, #tpu.memory_space<vmem>>)
    %c5_i32_99 = arith.constant 5 : i32
    %c5_i32_100 = arith.constant 5 : i32
    %c0_i32_101 = arith.constant 0 : i32
    %174 = tpu.memref_slice %arg2[%47, %c0_i32_101] : memref<5121x64xf32, #tpu.memory_space<any>> -> memref<1x64xf32, #tpu.memory_space<any>>
    %175 = tpu.memref_squeeze %174 : memref<1x64xf32, #tpu.memory_space<any>> -> memref<64xf32, #tpu.memory_space<any>>
    %c0_i32_102 = arith.constant 0 : i32
    %176 = tpu.memref_slice %arg6[%c5_i32_99, %c0_i32_102] : memref<16x64xf32, #tpu.memory_space<vmem>> -> memref<1x64xf32, #tpu.memory_space<vmem>>
    %177 = tpu.memref_squeeze %176 : memref<1x64xf32, #tpu.memory_space<vmem>> -> memref<64xf32, #tpu.memory_space<vmem>>
    %178 = tpu.memref_slice %arg7[%c5_i32_100] : memref<16x!tpu.dma_semaphore, #tpu.memory_space<semaphore_mem>> -> memref<1x!tpu.dma_semaphore, #tpu.memory_space<semaphore_mem>>
    %179 = tpu.memref_squeeze %178 : memref<1x!tpu.dma_semaphore, #tpu.memory_space<semaphore_mem>> -> memref<!tpu.dma_semaphore, #tpu.memory_space<semaphore_mem>>
    tpu.wait_dma2 semaphore(%179 : memref<!tpu.dma_semaphore, #tpu.memory_space<semaphore_mem>>) src(%175 : memref<64xf32, #tpu.memory_space<any>>) dst(%177 : memref<64xf32, #tpu.memory_space<vmem>>)
    %c6_i32_103 = arith.constant 6 : i32
    %c6_i32_104 = arith.constant 6 : i32
    %c0_i32_105 = arith.constant 0 : i32
    %180 = tpu.memref_slice %arg2[%56, %c0_i32_105] : memref<5121x64xf32, #tpu.memory_space<any>> -> memref<1x64xf32, #tpu.memory_space<any>>
    %181 = tpu.memref_squeeze %180 : memref<1x64xf32, #tpu.memory_space<any>> -> memref<64xf32, #tpu.memory_space<any>>
    %c0_i32_106 = arith.constant 0 : i32
    %182 = tpu.memref_slice %arg6[%c6_i32_103, %c0_i32_106] : memref<16x64xf32, #tpu.memory_space<vmem>> -> memref<1x64xf32, #tpu.memory_space<vmem>>
    %183 = tpu.memref_squeeze %182 : memref<1x64xf32, #tpu.memory_space<vmem>> -> memref<64xf32, #tpu.memory_space<vmem>>
    %184 = tpu.memref_slice %arg7[%c6_i32_104] : memref<16x!tpu.dma_semaphore, #tpu.memory_space<semaphore_mem>> -> memref<1x!tpu.dma_semaphore, #tpu.memory_space<semaphore_mem>>
    %185 = tpu.memref_squeeze %184 : memref<1x!tpu.dma_semaphore, #tpu.memory_space<semaphore_mem>> -> memref<!tpu.dma_semaphore, #tpu.memory_space<semaphore_mem>>
    tpu.wait_dma2 semaphore(%185 : memref<!tpu.dma_semaphore, #tpu.memory_space<semaphore_mem>>) src(%181 : memref<64xf32, #tpu.memory_space<any>>) dst(%183 : memref<64xf32, #tpu.memory_space<vmem>>)
    %c7_i32_107 = arith.constant 7 : i32
    %c7_i32_108 = arith.constant 7 : i32
    %c0_i32_109 = arith.constant 0 : i32
    %186 = tpu.memref_slice %arg2[%65, %c0_i32_109] : memref<5121x64xf32, #tpu.memory_space<any>> -> memref<1x64xf32, #tpu.memory_space<any>>
    %187 = tpu.memref_squeeze %186 : memref<1x64xf32, #tpu.memory_space<any>> -> memref<64xf32, #tpu.memory_space<any>>
    %c0_i32_110 = arith.constant 0 : i32
    %188 = tpu.memref_slice %arg6[%c7_i32_107, %c0_i32_110] : memref<16x64xf32, #tpu.memory_space<vmem>> -> memref<1x64xf32, #tpu.memory_space<vmem>>
    %189 = tpu.memref_squeeze %188 : memref<1x64xf32, #tpu.memory_space<vmem>> -> memref<64xf32, #tpu.memory_space<vmem>>
    %190 = tpu.memref_slice %arg7[%c7_i32_108] : memref<16x!tpu.dma_semaphore, #tpu.memory_space<semaphore_mem>> -> memref<1x!tpu.dma_semaphore, #tpu.memory_space<semaphore_mem>>
    %191 = tpu.memref_squeeze %190 : memref<1x!tpu.dma_semaphore, #tpu.memory_space<semaphore_mem>> -> memref<!tpu.dma_semaphore, #tpu.memory_space<semaphore_mem>>
    tpu.wait_dma2 semaphore(%191 : memref<!tpu.dma_semaphore, #tpu.memory_space<semaphore_mem>>) src(%187 : memref<64xf32, #tpu.memory_space<any>>) dst(%189 : memref<64xf32, #tpu.memory_space<vmem>>)
    %c8_i32_111 = arith.constant 8 : i32
    %c8_i32_112 = arith.constant 8 : i32
    %c0_i32_113 = arith.constant 0 : i32
    %192 = tpu.memref_slice %arg2[%74, %c0_i32_113] : memref<5121x64xf32, #tpu.memory_space<any>> -> memref<1x64xf32, #tpu.memory_space<any>>
    %193 = tpu.memref_squeeze %192 : memref<1x64xf32, #tpu.memory_space<any>> -> memref<64xf32, #tpu.memory_space<any>>
    %c0_i32_114 = arith.constant 0 : i32
    %194 = tpu.memref_slice %arg6[%c8_i32_111, %c0_i32_114] : memref<16x64xf32, #tpu.memory_space<vmem>> -> memref<1x64xf32, #tpu.memory_space<vmem>>
    %195 = tpu.memref_squeeze %194 : memref<1x64xf32, #tpu.memory_space<vmem>> -> memref<64xf32, #tpu.memory_space<vmem>>
    %196 = tpu.memref_slice %arg7[%c8_i32_112] : memref<16x!tpu.dma_semaphore, #tpu.memory_space<semaphore_mem>> -> memref<1x!tpu.dma_semaphore, #tpu.memory_space<semaphore_mem>>
    %197 = tpu.memref_squeeze %196 : memref<1x!tpu.dma_semaphore, #tpu.memory_space<semaphore_mem>> -> memref<!tpu.dma_semaphore, #tpu.memory_space<semaphore_mem>>
    tpu.wait_dma2 semaphore(%197 : memref<!tpu.dma_semaphore, #tpu.memory_space<semaphore_mem>>) src(%193 : memref<64xf32, #tpu.memory_space<any>>) dst(%195 : memref<64xf32, #tpu.memory_space<vmem>>)
    %c9_i32_115 = arith.constant 9 : i32
    %c9_i32_116 = arith.constant 9 : i32
    %c0_i32_117 = arith.constant 0 : i32
    %198 = tpu.memref_slice %arg2[%83, %c0_i32_117] : memref<5121x64xf32, #tpu.memory_space<any>> -> memref<1x64xf32, #tpu.memory_space<any>>
    %199 = tpu.memref_squeeze %198 : memref<1x64xf32, #tpu.memory_space<any>> -> memref<64xf32, #tpu.memory_space<any>>
    %c0_i32_118 = arith.constant 0 : i32
    %200 = tpu.memref_slice %arg6[%c9_i32_115, %c0_i32_118] : memref<16x64xf32, #tpu.memory_space<vmem>> -> memref<1x64xf32, #tpu.memory_space<vmem>>
    %201 = tpu.memref_squeeze %200 : memref<1x64xf32, #tpu.memory_space<vmem>> -> memref<64xf32, #tpu.memory_space<vmem>>
    %202 = tpu.memref_slice %arg7[%c9_i32_116] : memref<16x!tpu.dma_semaphore, #tpu.memory_space<semaphore_mem>> -> memref<1x!tpu.dma_semaphore, #tpu.memory_space<semaphore_mem>>
    %203 = tpu.memref_squeeze %202 : memref<1x!tpu.dma_semaphore, #tpu.memory_space<semaphore_mem>> -> memref<!tpu.dma_semaphore, #tpu.memory_space<semaphore_mem>>
    tpu.wait_dma2 semaphore(%203 : memref<!tpu.dma_semaphore, #tpu.memory_space<semaphore_mem>>) src(%199 : memref<64xf32, #tpu.memory_space<any>>) dst(%201 : memref<64xf32, #tpu.memory_space<vmem>>)
    %c10_i32_119 = arith.constant 10 : i32
    %c10_i32_120 = arith.constant 10 : i32
    %c0_i32_121 = arith.constant 0 : i32
    %204 = tpu.memref_slice %arg2[%92, %c0_i32_121] : memref<5121x64xf32, #tpu.memory_space<any>> -> memref<1x64xf32, #tpu.memory_space<any>>
    %205 = tpu.memref_squeeze %204 : memref<1x64xf32, #tpu.memory_space<any>> -> memref<64xf32, #tpu.memory_space<any>>
    %c0_i32_122 = arith.constant 0 : i32
    %206 = tpu.memref_slice %arg6[%c10_i32_119, %c0_i32_122] : memref<16x64xf32, #tpu.memory_space<vmem>> -> memref<1x64xf32, #tpu.memory_space<vmem>>
    %207 = tpu.memref_squeeze %206 : memref<1x64xf32, #tpu.memory_space<vmem>> -> memref<64xf32, #tpu.memory_space<vmem>>
    %208 = tpu.memref_slice %arg7[%c10_i32_120] : memref<16x!tpu.dma_semaphore, #tpu.memory_space<semaphore_mem>> -> memref<1x!tpu.dma_semaphore, #tpu.memory_space<semaphore_mem>>
    %209 = tpu.memref_squeeze %208 : memref<1x!tpu.dma_semaphore, #tpu.memory_space<semaphore_mem>> -> memref<!tpu.dma_semaphore, #tpu.memory_space<semaphore_mem>>
    tpu.wait_dma2 semaphore(%209 : memref<!tpu.dma_semaphore, #tpu.memory_space<semaphore_mem>>) src(%205 : memref<64xf32, #tpu.memory_space<any>>) dst(%207 : memref<64xf32, #tpu.memory_space<vmem>>)
    %c11_i32_123 = arith.constant 11 : i32
    %c11_i32_124 = arith.constant 11 : i32
    %c0_i32_125 = arith.constant 0 : i32
    %210 = tpu.memref_slice %arg2[%101, %c0_i32_125] : memref<5121x64xf32, #tpu.memory_space<any>> -> memref<1x64xf32, #tpu.memory_space<any>>
    %211 = tpu.memref_squeeze %210 : memref<1x64xf32, #tpu.memory_space<any>> -> memref<64xf32, #tpu.memory_space<any>>
    %c0_i32_126 = arith.constant 0 : i32
    %212 = tpu.memref_slice %arg6[%c11_i32_123, %c0_i32_126] : memref<16x64xf32, #tpu.memory_space<vmem>> -> memref<1x64xf32, #tpu.memory_space<vmem>>
    %213 = tpu.memref_squeeze %212 : memref<1x64xf32, #tpu.memory_space<vmem>> -> memref<64xf32, #tpu.memory_space<vmem>>
    %214 = tpu.memref_slice %arg7[%c11_i32_124] : memref<16x!tpu.dma_semaphore, #tpu.memory_space<semaphore_mem>> -> memref<1x!tpu.dma_semaphore, #tpu.memory_space<semaphore_mem>>
    %215 = tpu.memref_squeeze %214 : memref<1x!tpu.dma_semaphore, #tpu.memory_space<semaphore_mem>> -> memref<!tpu.dma_semaphore, #tpu.memory_space<semaphore_mem>>
    tpu.wait_dma2 semaphore(%215 : memref<!tpu.dma_semaphore, #tpu.memory_space<semaphore_mem>>) src(%211 : memref<64xf32, #tpu.memory_space<any>>) dst(%213 : memref<64xf32, #tpu.memory_space<vmem>>)
    %c12_i32_127 = arith.constant 12 : i32
    %c12_i32_128 = arith.constant 12 : i32
    %c0_i32_129 = arith.constant 0 : i32
    %216 = tpu.memref_slice %arg2[%110, %c0_i32_129] : memref<5121x64xf32, #tpu.memory_space<any>> -> memref<1x64xf32, #tpu.memory_space<any>>
    %217 = tpu.memref_squeeze %216 : memref<1x64xf32, #tpu.memory_space<any>> -> memref<64xf32, #tpu.memory_space<any>>
    %c0_i32_130 = arith.constant 0 : i32
    %218 = tpu.memref_slice %arg6[%c12_i32_127, %c0_i32_130] : memref<16x64xf32, #tpu.memory_space<vmem>> -> memref<1x64xf32, #tpu.memory_space<vmem>>
    %219 = tpu.memref_squeeze %218 : memref<1x64xf32, #tpu.memory_space<vmem>> -> memref<64xf32, #tpu.memory_space<vmem>>
    %220 = tpu.memref_slice %arg7[%c12_i32_128] : memref<16x!tpu.dma_semaphore, #tpu.memory_space<semaphore_mem>> -> memref<1x!tpu.dma_semaphore, #tpu.memory_space<semaphore_mem>>
    %221 = tpu.memref_squeeze %220 : memref<1x!tpu.dma_semaphore, #tpu.memory_space<semaphore_mem>> -> memref<!tpu.dma_semaphore, #tpu.memory_space<semaphore_mem>>
    tpu.wait_dma2 semaphore(%221 : memref<!tpu.dma_semaphore, #tpu.memory_space<semaphore_mem>>) src(%217 : memref<64xf32, #tpu.memory_space<any>>) dst(%219 : memref<64xf32, #tpu.memory_space<vmem>>)
    %c13_i32_131 = arith.constant 13 : i32
    %c13_i32_132 = arith.constant 13 : i32
    %c0_i32_133 = arith.constant 0 : i32
    %222 = tpu.memref_slice %arg2[%119, %c0_i32_133] : memref<5121x64xf32, #tpu.memory_space<any>> -> memref<1x64xf32, #tpu.memory_space<any>>
    %223 = tpu.memref_squeeze %222 : memref<1x64xf32, #tpu.memory_space<any>> -> memref<64xf32, #tpu.memory_space<any>>
    %c0_i32_134 = arith.constant 0 : i32
    %224 = tpu.memref_slice %arg6[%c13_i32_131, %c0_i32_134] : memref<16x64xf32, #tpu.memory_space<vmem>> -> memref<1x64xf32, #tpu.memory_space<vmem>>
    %225 = tpu.memref_squeeze %224 : memref<1x64xf32, #tpu.memory_space<vmem>> -> memref<64xf32, #tpu.memory_space<vmem>>
    %226 = tpu.memref_slice %arg7[%c13_i32_132] : memref<16x!tpu.dma_semaphore, #tpu.memory_space<semaphore_mem>> -> memref<1x!tpu.dma_semaphore, #tpu.memory_space<semaphore_mem>>
    %227 = tpu.memref_squeeze %226 : memref<1x!tpu.dma_semaphore, #tpu.memory_space<semaphore_mem>> -> memref<!tpu.dma_semaphore, #tpu.memory_space<semaphore_mem>>
    tpu.wait_dma2 semaphore(%227 : memref<!tpu.dma_semaphore, #tpu.memory_space<semaphore_mem>>) src(%223 : memref<64xf32, #tpu.memory_space<any>>) dst(%225 : memref<64xf32, #tpu.memory_space<vmem>>)
    %c14_i32_135 = arith.constant 14 : i32
    %c14_i32_136 = arith.constant 14 : i32
    %c0_i32_137 = arith.constant 0 : i32
    %228 = tpu.memref_slice %arg2[%128, %c0_i32_137] : memref<5121x64xf32, #tpu.memory_space<any>> -> memref<1x64xf32, #tpu.memory_space<any>>
    %229 = tpu.memref_squeeze %228 : memref<1x64xf32, #tpu.memory_space<any>> -> memref<64xf32, #tpu.memory_space<any>>
    %c0_i32_138 = arith.constant 0 : i32
    %230 = tpu.memref_slice %arg6[%c14_i32_135, %c0_i32_138] : memref<16x64xf32, #tpu.memory_space<vmem>> -> memref<1x64xf32, #tpu.memory_space<vmem>>
    %231 = tpu.memref_squeeze %230 : memref<1x64xf32, #tpu.memory_space<vmem>> -> memref<64xf32, #tpu.memory_space<vmem>>
    %232 = tpu.memref_slice %arg7[%c14_i32_136] : memref<16x!tpu.dma_semaphore, #tpu.memory_space<semaphore_mem>> -> memref<1x!tpu.dma_semaphore, #tpu.memory_space<semaphore_mem>>
    %233 = tpu.memref_squeeze %232 : memref<1x!tpu.dma_semaphore, #tpu.memory_space<semaphore_mem>> -> memref<!tpu.dma_semaphore, #tpu.memory_space<semaphore_mem>>
    tpu.wait_dma2 semaphore(%233 : memref<!tpu.dma_semaphore, #tpu.memory_space<semaphore_mem>>) src(%229 : memref<64xf32, #tpu.memory_space<any>>) dst(%231 : memref<64xf32, #tpu.memory_space<vmem>>)
    %c15_i32_139 = arith.constant 15 : i32
    %c15_i32_140 = arith.constant 15 : i32
    %c0_i32_141 = arith.constant 0 : i32
    %234 = tpu.memref_slice %arg2[%137, %c0_i32_141] : memref<5121x64xf32, #tpu.memory_space<any>> -> memref<1x64xf32, #tpu.memory_space<any>>
    %235 = tpu.memref_squeeze %234 : memref<1x64xf32, #tpu.memory_space<any>> -> memref<64xf32, #tpu.memory_space<any>>
    %c0_i32_142 = arith.constant 0 : i32
    %236 = tpu.memref_slice %arg6[%c15_i32_139, %c0_i32_142] : memref<16x64xf32, #tpu.memory_space<vmem>> -> memref<1x64xf32, #tpu.memory_space<vmem>>
    %237 = tpu.memref_squeeze %236 : memref<1x64xf32, #tpu.memory_space<vmem>> -> memref<64xf32, #tpu.memory_space<vmem>>
    %238 = tpu.memref_slice %arg7[%c15_i32_140] : memref<16x!tpu.dma_semaphore, #tpu.memory_space<semaphore_mem>> -> memref<1x!tpu.dma_semaphore, #tpu.memory_space<semaphore_mem>>
    %239 = tpu.memref_squeeze %238 : memref<1x!tpu.dma_semaphore, #tpu.memory_space<semaphore_mem>> -> memref<!tpu.dma_semaphore, #tpu.memory_space<semaphore_mem>>
    tpu.wait_dma2 semaphore(%239 : memref<!tpu.dma_semaphore, #tpu.memory_space<semaphore_mem>>) src(%235 : memref<64xf32, #tpu.memory_space<any>>) dst(%237 : memref<64xf32, #tpu.memory_space<vmem>>)
    %c0_143 = arith.constant 0 : index
    %c0_144 = arith.constant 0 : index
    %240 = vector.load %arg6[%c0_143, %c0_144] : memref<16x64xf32, #tpu.memory_space<vmem>>, vector<16x64xf32>
    %c0_145 = arith.constant 0 : index
    %c0_146 = arith.constant 0 : index
    %241 = vector.load %arg3[%c0_145, %c0_146] : memref<64x64xf32, #tpu.memory_space<vmem>>, vector<64x64xf32>
    %cst = arith.constant dense<0.000000e+00> : vector<16x64xf32>
    %242 = tpu.matmul %240, %241, %cst {dimension_numbers = #tpu.dot_dimension_numbers<[1], [0], [0], [1], [0, 0, 1, 1], [], []>} : vector<16x64xf32>, vector<64x64xf32>, vector<16x64xf32> -> vector<16x64xf32>
    %c0_147 = arith.constant 0 : index
    %c0_148 = arith.constant 0 : index
    %243 = vector.load %arg4[%c0_147, %c0_148] : memref<1x64xf32, #tpu.memory_space<vmem>>, vector<1x64xf32>
    %244 = vector.broadcast %243 : vector<1x64xf32> to vector<16x64xf32>
    %245 = arith.addf %242, %244 : vector<16x64xf32>
    %c0_149 = arith.constant 0 : index
    %c0_150 = arith.constant 0 : index
    %246 = vector.load %arg5[%c0_149, %c0_150] : memref<16x64xf32, #tpu.memory_space<vmem>>, vector<16x64xf32>
    tpu.vector_store %arg5[%c0_149, %c0_150], %245 {strides = array<i32>} : memref<16x64xf32, #tpu.memory_space<vmem>>, vector<16x64xf32>,
    return
  }
  func.func @transform_1(%arg0: i32, %arg1: memref<16xi32, #tpu.memory_space<smem>>) -> (i32, i32) {
    %c0_i32 = arith.constant 0 : i32
    %c0_i32_0 = arith.constant 0 : i32
    %c0_i32_1 = arith.constant 0 : i32
    return %c0_i32, %c0_i32_0 : i32, i32
  }
  func.func @transform_2(%arg0: i32, %arg1: memref<16xi32, #tpu.memory_space<smem>>) -> (i32, i32) {
    %c0_i32 = arith.constant 0 : i32
    %c0_i32_0 = arith.constant 0 : i32
    %c0_i32_1 = arith.constant 0 : i32
    return %c0_i32, %c0_i32_0 : i32, i32
  }
  func.func @transform_3(%arg0: i32, %arg1: memref<16xi32, #tpu.memory_space<smem>>) -> (i32, i32) {
    %c0_i32 = arith.constant 0 : i32
    %c0_i32_0 = arith.constant 0 : i32
    %c0_i32_1 = arith.constant 0 : i32
    return %c0_i32, %c0_i32_0 : i32, i32
  }
}

</mosaic_0001>

<bundles_post_ra>
// kernel: tpu_custom_call.1
= control target key start
LH: loop header
LB: loop body
LE: loop exit
PB: predicated region body
PF: predicated region fallthrough
CT: control target
= control target key end

     0   :  { %s1689_s0 = inlined_call_operand.vmem [shape: s32[16], index: 0, kind: input, shape index: {}]   ;;  %s1690_s1 = inlined_call_operand.vmem [shape: f32[5121,64], index: 1, kind: input, shape index: {}]   ;;  %s1691_s2 = inlined_call_operand.vmem [shape: f32[64,64], index: 2, kind: input, shape index: {}]   ;;  %s1692_s3 = inlined_call_operand.vmem [shape: f32[1,64], index: 3, kind: input, shape index: {}]   ;;  %s1693_s4 = inlined_call_operand.hbm [shape: f32[16,64], index: 4, kind: output, shape index: {}]  }
   0x1   :  { %s9_s17 = sshll.u32 %s1689_s0, 4  ;;  %s10_s17 = int_to_ptr.vmem [resolvable:$true] %s9_s17 }
   0x2   :  { %s1496_s18 = scalar_lea.vmem %s10_s17, 16  ;;  %p1501_p1 = scmp.lt.s32.totalorder %s10_s17, %s10_s17 }
   0x3   :  { %p1497_p0 = scmp.ne.s32.totalorder %s10_s17, %s1496_s18  ;;  %p1502_p2 = scmp.lt.s32.totalorder %s1496_s18, %s1496_s18 }
   0x5   :  { %p1503_p3 = por %p1502_p2, %p1501_p1 }
   0x7   :  { %p1504_p4 = pnand %p1503_p3, %p1497_p0 }
   0x9   :  { %1507 = shalt.err (!%p1504_p4)  }
   0xa   :  { %s1566_s19 = smov [#allocation5]  }
   0xb   :  { %12 = dma.vmem_to_smem %s10_s17, 16, %s1566_s19, [#allocation4] }
   0xc   :  { %1530 = dma.done.wait [#allocation4], 16 }
   0xd   :  { %1531 = vsyncadd [#allocation4], 4294967280 }
   0xe   :  { %14 = sfence }
   0xf   :  { %15 = vsyncpa [#allocation7], 0  ;;  %s20_s20 = sld [smem:[#allocation5]] }
  0x15   :  { %p21_p5 = scmp.gt.s32.totalorder %s20_s20, 0  ;;  %p1301_p6 = scmp.lt.s32.totalorder %s20_s20, 5120 }
  0x17   :  { %s1695_s20 = smov (!%p21_p5, %s20_s20), 0 }
  0x18   :  { %s1697_s20 = smov (!%p1301_p6, %s1695_s20), 5120 }
  0x19   :  { %s25_s22 = scalar_lea.vmem %s1690_s1, %s1697_s20 }
  0x1a   :  { %v43_v0 = vld [vmem:[%s25_s22] sm:$0x1] }
  0x1b   :  { %44 = vst [vmem:[#allocation2] sm:$0x1] %v43_v0 }
  0x1c   :  { %69 = vsyncadd [#allocation3], 16  ;;  %s1306_s23 = sld [smem:[#allocation5 + $0x1]] }
  0x22   :  { %p71_p7 = scmp.gt.s32.totalorder %s1306_s23, 0  ;;  %p1307_p8 = scmp.lt.s32.totalorder %s1306_s23, 5120 }
  0x24   :  { %s1699_s23 = smov (!%p71_p7, %s1306_s23), 0 }
  0x25   :  { %s1701_s23 = smov (!%p1307_p8, %s1699_s23), 5120 }
  0x26   :  { %s75_s26 = scalar_lea.vmem %s1690_s1, %s1701_s23 }
  0x27   :  { %v95_v1 = vld [vmem:[%s75_s26] sm:$0x1] }
  0x28   :  { %96 = vst [vmem:[#allocation2 + $0x1] sm:$0x1] %v95_v1 }
  0x29   :  { %121 = vsyncadd [#allocation3 + $0x1], 16  ;;  %s1312_s27 = sld [smem:[#allocation5 + $0x2]] }
  0x2f   :  { %p123_p9 = scmp.gt.s32.totalorder %s1312_s27, 0  ;;  %p1313_p10 = scmp.lt.s32.totalorder %s1312_s27, 5120 }
  0x31   :  { %s1703_s27 = smov (!%p123_p9, %s1312_s27), 0 }
  0x32   :  { %s1705_s27 = smov (!%p1313_p10, %s1703_s27), 5120 }
  0x33   :  { %s127_s30 = scalar_lea.vmem %s1690_s1, %s1705_s27 }
  0x34   :  { %v147_v2 = vld [vmem:[%s127_s30] sm:$0x1] }
  0x35   :  { %148 = vst [vmem:[#allocation2 + $0x2] sm:$0x1] %v147_v2 }
  0x36   :  { %173 = vsyncadd [#allocation3 + $0x2], 16  ;;  %s1318_s5 = sld [smem:[#allocation5 + $0x3]] }
  0x3c   :  { %p175_p11 = scmp.gt.s32.totalorder %s1318_s5, 0  ;;  %p1319_p12 = scmp.lt.s32.totalorder %s1318_s5, 5120 }
  0x3e   :  { %s1707_s5 = smov (!%p175_p11, %s1318_s5), 0 }
  0x3f   :  { %s1709_s5 = smov (!%p1319_p12, %s1707_s5), 5120 }
  0x40   :  { %s179_s8 = scalar_lea.vmem %s1690_s1, %s1709_s5 }
  0x41   :  { %v199_v3 = vld [vmem:[%s179_s8] sm:$0x1] }
  0x42   :  { %200 = vst [vmem:[#allocation2 + $0x3] sm:$0x1] %v199_v3 }
  0x43   :  { %225 = vsyncadd [#allocation3 + $0x3], 16  ;;  %s1324_s9 = sld [smem:[#allocation5 + $0x4]] }
  0x49   :  { %p227_p13 = scmp.gt.s32.totalorder %s1324_s9, 0  ;;  %p1325_p0 = scmp.lt.s32.totalorder %s1324_s9, 5120 }
  0x4b   :  { %s1711_s9 = smov (!%p227_p13, %s1324_s9), 0 }
  0x4c   :  { %s1713_s9 = smov (!%p1325_p0, %s1711_s9), 5120 }
  0x4d   :  { %s231_s12 = scalar_lea.vmem %s1690_s1, %s1713_s9 }
  0x4e   :  { %v251_v4 = vld [vmem:[%s231_s12] sm:$0x1] }
  0x4f   :  { %252 = vst [vmem:[#allocation2 + $0x4] sm:$0x1] %v251_v4 }
  0x50   :  { %277 = vsyncadd [#allocation3 + $0x4], 16  ;;  %s1330_s13 = sld [smem:[#allocation5 + $0x5]] }
  0x56   :  { %p279_p1 = scmp.gt.s32.totalorder %s1330_s13, 0  ;;  %p1331_p2 = scmp.lt.s32.totalorder %s1330_s13, 5120 }
  0x58   :  { %s1715_s13 = smov (!%p279_p1, %s1330_s13), 0 }
  0x59   :  { %s1717_s13 = smov (!%p1331_p2, %s1715_s13), 5120 }
  0x5a   :  { %s283_s16 = scalar_lea.vmem %s1690_s1, %s1717_s13 }
  0x5b   :  { %v303_v5 = vld [vmem:[%s283_s16] sm:$0x1] }
  0x5c   :  { %304 = vst [vmem:[#allocation2 + $0x5] sm:$0x1] %v303_v5 }
  0x5d   :  { %329 = vsyncadd [#allocation3 + $0x5], 16  ;;  %s1336_s17 = sld [smem:[#allocation5 + $0x6]] }
  0x63   :  { %p331_p3 = scmp.gt.s32.totalorder %s1336_s17, 0  ;;  %p1337_p4 = scmp.lt.s32.totalorder %s1336_s17, 5120 }
  0x65   :  { %s1719_s17 = smov (!%p331_p3, %s1336_s17), 0 }
  0x66   :  { %s1721_s17 = smov (!%p1337_p4, %s1719_s17), 5120 }
  0x67   :  { %s335_s20 = scalar_lea.vmem %s1690_s1, %s1721_s17 }
  0x68   :  { %v355_v6 = vld [vmem:[%s335_s20] sm:$0x1] }
  0x69   :  { %356 = vst [vmem:[#allocation2 + $0x6] sm:$0x1] %v355_v6 }
  0x6a   :  { %381 = vsyncadd [#allocation3 + $0x6], 16  ;;  %s1342_s0 = sld [smem:[#allocation5 + $0x7]] }
  0x70   :  { %p383_p5 = scmp.gt.s32.totalorder %s1342_s0, 0  ;;  %p1343_p6 = scmp.lt.s32.totalorder %s1342_s0, 5120 }
  0x72   :  { %s1723_s0 = smov (!%p383_p5, %s1342_s0), 0 }
  0x73   :  { %s1725_s0 = smov (!%p1343_p6, %s1723_s0), 5120 }
  0x74   :  { %s387_s23 = scalar_lea.vmem %s1690_s1, %s1725_s0 }
  0x75   :  { %v407_v7 = vld [vmem:[%s387_s23] sm:$0x1] }
  0x76   :  { %408 = vst [vmem:[#allocation2 + $0x7] sm:$0x1] %v407_v7 }
  0x77   :  { %433 = vsyncadd [#allocation3 + $0x7], 16  ;;  %s1348_s24 = sld [smem:[#allocation5 + $0x8]] }
  0x7d   :  { %p435_p7 = scmp.gt.s32.totalorder %s1348_s24, 0  ;;  %p1349_p8 = scmp.lt.s32.totalorder %s1348_s24, 5120 }
  0x7f   :  { %s1727_s24 = smov (!%p435_p7, %s1348_s24), 0 }
  0x80   :  { %s1729_s24 = smov (!%p1349_p8, %s1727_s24), 5120 }
  0x81   :  { %s439_s27 = scalar_lea.vmem %s1690_s1, %s1729_s24 }
  0x82   :  { %v459_v8 = vld [vmem:[%s439_s27] sm:$0x1] }
  0x83   :  { %460 = vst [vmem:[#allocation2 + $0x8] sm:$0x1] %v459_v8 }
  0x84   :  { %485 = vsyncadd [#allocation3 + $0x8], 16  ;;  %s1354_s28 = sld [smem:[#allocation5 + $0x9]] }
  0x8a   :  { %p487_p9 = scmp.gt.s32.totalorder %s1354_s28, 0  ;;  %p1355_p10 = scmp.lt.s32.totalorder %s1354_s28, 5120 }
  0x8c   :  { %s1731_s28 = smov (!%p487_p9, %s1354_s28), 0 }
  0x8d   :  { %s1733_s28 = smov (!%p1355_p10, %s1731_s28), 5120 }
  0x8e   :  { %s491_s5 = scalar_lea.vmem %s1690_s1, %s1733_s28 }
  0x8f   :  { %v511_v9 = vld [vmem:[%s491_s5] sm:$0x1] }
  0x90   :  { %512 = vst [vmem:[#allocation2 + $0x9] sm:$0x1] %v511_v9 }
  0x91   :  { %537 = vsyncadd [#allocation3 + $0x9], 16  ;;  %s1360_s6 = sld [smem:[#allocation5 + $0xa]] }
  0x97   :  { %p539_p11 = scmp.gt.s32.totalorder %s1360_s6, 0  ;;  %p1361_p12 = scmp.lt.s32.totalorder %s1360_s6, 5120 }
  0x99   :  { %s1735_s6 = smov (!%p539_p11, %s1360_s6), 0 }
  0x9a   :  { %s1737_s6 = smov (!%p1361_p12, %s1735_s6), 5120 }
  0x9b   :  { %s543_s9 = scalar_lea.vmem %s1690_s1, %s1737_s6 }
  0x9c   :  { %v563_v10 = vld [vmem:[%s543_s9] sm:$0x1] }
  0x9d   :  { %564 = vst [vmem:[#allocation2 + $0xa] sm:$0x1] %v563_v10 }
  0x9e   :  { %589 = vsyncadd [#allocation3 + $0xa], 16  ;;  %s1366_s10 = sld [smem:[#allocation5 + $0xb]] }
  0xa4   :  { %p591_p13 = scmp.gt.s32.totalorder %s1366_s10, 0  ;;  %p1367_p0 = scmp.lt.s32.totalorder %s1366_s10, 5120 }
  0xa6   :  { %s1739_s10 = smov (!%p591_p13, %s1366_s10), 0 }
  0xa7   :  { %s1741_s10 = smov (!%p1367_p0, %s1739_s10), 5120 }
  0xa8   :  { %s595_s13 = scalar_lea.vmem %s1690_s1, %s1741_s10 }
  0xa9   :  { %v615_v11 = vld [vmem:[%s595_s13] sm:$0x1] }
  0xaa   :  { %616 = vst [vmem:[#allocation2 + $0xb] sm:$0x1] %v615_v11 }
  0xab   :  { %641 = vsyncadd [#allocation3 + $0xb], 16  ;;  %s1372_s14 = sld [smem:[#allocation5 + $0xc]] }
  0xb1   :  { %p643_p1 = scmp.gt.s32.totalorder %s1372_s14, 0  ;;  %p1373_p2 = scmp.lt.s32.totalorder %s1372_s14, 5120 }
  0xb3   :  { %s1743_s14 = smov (!%p643_p1, %s1372_s14), 0 }
  0xb4   :  { %s1745_s14 = smov (!%p1373_p2, %s1743_s14), 5120 }
  0xb5   :  { %s647_s17 = scalar_lea.vmem %s1690_s1, %s1745_s14 }
  0xb6   :  { %v667_v12 = vld [vmem:[%s647_s17] sm:$0x1] }
  0xb7   :  { %668 = vst [vmem:[#allocation2 + $0xc] sm:$0x1] %v667_v12 }
  0xb8   :  { %693 = vsyncadd [#allocation3 + $0xc], 16  ;;  %s1378_s18 = sld [smem:[#allocation5 + $0xd]] }
  0xbe   :  { %p695_p3 = scmp.gt.s32.totalorder %s1378_s18, 0  ;;  %p1379_p4 = scmp.lt.s32.totalorder %s1378_s18, 5120 }
  0xc0   :  { %s1747_s18 = smov (!%p695_p3, %s1378_s18), 0 }
  0xc1   :  { %s1749_s18 = smov (!%p1379_p4, %s1747_s18), 5120 }
  0xc2   :  { %s699_s0 = scalar_lea.vmem %s1690_s1, %s1749_s18 }
  0xc3   :  { %v719_v13 = vld [vmem:[%s699_s0] sm:$0x1] }
  0xc4   :  { %720 = vst [vmem:[#allocation2 + $0xd] sm:$0x1] %v719_v13 }
  0xc5   :  { %745 = vsyncadd [#allocation3 + $0xd], 16  ;;  %s1384_s21 = sld [smem:[#allocation5 + $0xe]] }
  0xcb   :  { %p747_p5 = scmp.gt.s32.totalorder %s1384_s21, 0  ;;  %p1385_p6 = scmp.lt.s32.totalorder %s1384_s21, 5120 }
  0xcd   :  { %s1751_s21 = smov (!%p747_p5, %s1384_s21), 0 }
  0xce   :  { %s1753_s21 = smov (!%p1385_p6, %s1751_s21), 5120 }
  0xcf   :  { %s751_s24 = scalar_lea.vmem %s1690_s1, %s1753_s21 }
  0xd0   :  { %v771_v14 = vld [vmem:[%s751_s24] sm:$0x1] }
  0xd1   :  { %772 = vst [vmem:[#allocation2 + $0xe] sm:$0x1] %v771_v14 }
  0xd2   :  { %797 = vsyncadd [#allocation3 + $0xe], 16  ;;  %s1390_s25 = sld [smem:[#allocation5 + $0xf]] }
  0xd8   :  { %p799_p7 = scmp.gt.s32.totalorder %s1390_s25, 0  ;;  %p1391_p8 = scmp.lt.s32.totalorder %s1390_s25, 5120 }
  0xda   :  { %s1755_s25 = smov (!%p799_p7, %s1390_s25), 0 }
  0xdb   :  { %s1757_s25 = smov (!%p1391_p8, %s1755_s25), 5120 }
  0xdc   :  { %s803_s28 = scalar_lea.vmem %s1690_s1, %s1757_s25 }
  0xdd   :  { %v823_v15 = vld [vmem:[%s803_s28] sm:$0x1] }
  0xde   :  { %824 = vst [vmem:[#allocation2 + $0xf] sm:$0x1] %v823_v15 }
  0xdf   :  { %849 = vsyncadd [#allocation3 + $0xf], 16 }
  0xe0   :  { %1532 = dma.done.wait [#allocation3], 16 }
  0xe1   :  { %1533 = vsyncadd [#allocation3], 4294967280 }
  0xe2   :  { %1534 = dma.done.wait [#allocation3 + $0x1], 16 }
  0xe3   :  { %1535 = vsyncadd [#allocation3 + $0x1], 4294967280 }
  0xe4   :  { %1536 = dma.done.wait [#allocation3 + $0x2], 16 }
  0xe5   :  { %1537 = vsyncadd [#allocation3 + $0x2], 4294967280 }
  0xe6   :  { %1538 = dma.done.wait [#allocation3 + $0x3], 16 }
  0xe7   :  { %1539 = vsyncadd [#allocation3 + $0x3], 4294967280 }
  0xe8   :  { %1540 = dma.done.wait [#allocation3 + $0x4], 16 }
  0xe9   :  { %1541 = vsyncadd [#allocation3 + $0x4], 4294967280 }
  0xea   :  { %1542 = dma.done.wait [#allocation3 + $0x5], 16 }
  0xeb   :  { %1543 = vsyncadd [#allocation3 + $0x5], 4294967280 }
  0xec   :  { %1544 = dma.done.wait [#allocation3 + $0x6], 16 }
  0xed   :  { %1545 = vsyncadd [#allocation3 + $0x6], 4294967280 }
  0xee   :  { %1546 = dma.done.wait [#allocation3 + $0x7], 16 }
  0xef   :  { %1547 = vsyncadd [#allocation3 + $0x7], 4294967280 }
  0xf0   :  { %1548 = dma.done.wait [#allocation3 + $0x8], 16 }
  0xf1   :  { %1549 = vsyncadd [#allocation3 + $0x8], 4294967280 }
  0xf2   :  { %1550 = dma.done.wait [#allocation3 + $0x9], 16 }
  0xf3   :  { %1551 = vsyncadd [#allocation3 + $0x9], 4294967280 }
  0xf4   :  { %1552 = dma.done.wait [#allocation3 + $0xa], 16 }
  0xf5   :  { %1553 = vsyncadd [#allocation3 + $0xa], 4294967280 }
  0xf6   :  { %1554 = dma.done.wait [#allocation3 + $0xb], 16 }
  0xf7   :  { %1555 = vsyncadd [#allocation3 + $0xb], 4294967280 }
  0xf8   :  { %1556 = dma.done.wait [#allocation3 + $0xc], 16 }
  0xf9   :  { %1557 = vsyncadd [#allocation3 + $0xc], 4294967280 }
  0xfa   :  { %1558 = dma.done.wait [#allocation3 + $0xd], 16 }
  0xfb   :  { %1559 = vsyncadd [#allocation3 + $0xd], 4294967280 }
  0xfc   :  { %1560 = dma.done.wait [#allocation3 + $0xe], 16 }
  0xfd   :  { %1561 = vsyncadd [#allocation3 + $0xe], 4294967280 }
  0xfe   :  { %1562 = dma.done.wait [#allocation3 + $0xf], 16 }
  0xff   :  { %1563 = vsyncadd [#allocation3 + $0xf], 4294967280  ;;  %v884_v16 = vld [vmem:[%s1691_s2] sm:$0xff]  ;;  %v885_v17 = vld [vmem:[%s1691_s2 + $0x8] sm:$0xff]  ;;  %vm899_vm0 = vcmask 523264   ;;  %s1567_s20 = smov [#allocation6]  }
 0x100   :  { %v886_v18 = vld [vmem:[%s1691_s2 + $0x10] sm:$0xff]  ;;  %v1476_v19 = vpack.c.bf16 %v885_v17, %v884_v16  ;;  %v887_v20 = vld [vmem:[%s1691_s2 + $0x18] sm:$0xff]  ;;  %v888_v22 = vld [vmem:[%s1691_s2 + $0x20] sm:$0xff]  ;;  %s988_s0 = sshll.u32 %s1567_s20, 4  ;;  %s989_s0 = int_to_ptr.vmem [resolvable:$true] %s988_s0 }
 0x101   :  { %v1480_v21 = vpack.c.bf16 %v887_v20, %v886_v18  ;;  %v889_v23 = vld [vmem:[%s1691_s2 + $0x28] sm:$0xff]  ;;  %v882_v24 = vld [vmem:[#allocation2] sm:$0xff]  ;;  %v890_v26 = vld [vmem:[%s1691_s2 + $0x30] sm:$0xff]  ;;  %p1513_p10 = scmp.lt.s32.totalorder %s989_s0, %s989_s0 }
 0x102   :  { %1477 = vmatprep.subr.bf16.mxu0 %v1476_v19  ;;  %1473 = vmatprep.mubr.msk.f32.mxu0 %vm899_vm0, %v882_v24  ;;  %v1484_v25 = vpack.c.bf16 %v889_v23, %v888_v22  ;;  %v891_v27 = vld [vmem:[%s1691_s2 + $0x38] sm:$0xff]  ;;  %v883_v29 = vld [vmem:[#allocation2 + $0x8] sm:$0xff]  ;;  %v1396_v30 = vld [vmem:[%s1692_s3] ss:$0 sm:$0xff]  ;;  %s1508_s2 = scalar_lea.vmem %s989_s0, 256 }
 0x103   :  { %1479 = vmatpush3.bf16.msra.mxu0 %v1476_v19  ;;  %v1488_v28 = vpack.c.bf16 %v891_v27, %v890_v26  ;;  %p1509_p9 = scmp.ne.s32.totalorder %s989_s0, %s1508_s2  ;;  %p1514_p11 = scmp.lt.s32.totalorder %s1508_s2, %s1508_s2 }
 0x104   :  { %1481 = vmatprep.subr.bf16.mxu0 %v1480_v21 }
 0x105   :  { %p1515_p12 = por %p1514_p11, %p1513_p10 }
 0x107   :  { %1483 = vmatpush3.bf16.msra.mxu0 %v1480_v21  ;;  %p1516_p13 = pnand %p1515_p12, %p1509_p9 }
 0x108   :  { %1485 = vmatprep.subr.bf16.mxu0 %v1484_v25 }
 0x10b   :  { %1487 = vmatpush3.bf16.msra.mxu0 %v1484_v25 }
 0x10c   :  { %1489 = vmatprep.subr.bf16.mxu0 %v1488_v28 }
 0x10f   :  { %1491 = vmatpush3.bf16.msra.mxu0 %v1488_v28 }
 0x112   :  { %1474 = vmatmul.mubr.msk.f32.vlgmr.msra.gmra.mrb[0].mxu0 %vm899_vm0, %v883_v29 }
 0x1e5   :  { %v1475_v31 = vpop.f32.mrb[0].mxu0 }
 0x1e6   :  { %v978_v32 = vadd.f32 %v1475_v31, %v1396_v30  ;;  %v972_v33 = vpop.f32.mrb[1].mxu0 }
 0x1e7   :  { %v973_v34 = vadd.f32 %v1396_v30, %v972_v33 }
 0x1e8   :  { %982 = vst.msk [vmem:[#allocation6 + $0x8] sm:$0xff] %vm899_vm0, %v978_v32 }
 0x1e9   :  { %981 = vst.msk [vmem:[#allocation6] sm:$0xff] %vm899_vm0, %v973_v34 }
 0x1ea   :  { %1519 = shalt.err (!%p1516_p13)
}
 0x1eb   :  { %s1520_s22 = scalar_lea.hbm %s1693_s4, 256 }
 0x1ec   :  { %p1521_p0 = scmp.ne.s32.totalorder %s1693_s4, %s1520_s22  ;;  %p1524_p1 = scmp.lt.u32.totalorder %s1520_s22, %s1693_s4 }
 0x1ee   :  { %p1526_p2 = pnand %p1524_p1, %p1521_p0 }
 0x1f0   :  { %1529 = shalt.err (!%p1526_p2)
}
 0x1f1   :  { %s1568_s27 = smov 128   ;;  %s1569_s28 = smov 8  }
 0x1f2   :  { %994 = dma.vmem_to_hbm [thread:$0]  %s989_s0, 256, %s1693_s4, [#allocation7], %s1568_s27, %s1568_s27, %s1569_s28  }
 0x1f3   :  { %1564 = dma.done.wait [#allocation7], 256  }
 0x1f4   :  { %1565 = vsyncadd [#allocation7], 4294967040 }
 0x1f5   :  { %998 = vsyncpa [#allocation7], 1 }
 0x1f6   :  { %999 = vsyncmov [#allocation3] }
 0x1f9   :  { %s1000_s30 = vpop.sfrf %999 }
 0x1fa   :  { %p1399_p3 = scmp.ne.s32.totalorder %s1000_s30, 0 }
 0x1fc   :  { %1004 = shalt.err (%p1399_p3)  }
 0x1fd   :  { %1006 = vsyncmov [#allocation3 + $0x1] }
 0x200   :  { %s1007_s5 = vpop.sfrf %1006 }
 0x201   :  { %p1400_p4 = scmp.ne.s32.totalorder %s1007_s5, 0 }
 0x203   :  { %1011 = shalt.err (%p1400_p4)  }
 0x204   :  { %1013 = vsyncmov [#allocation3 + $0x2] }
 0x207   :  { %s1014_s6 = vpop.sfrf %1013 }
 0x208   :  { %p1401_p5 = scmp.ne.s32.totalorder %s1014_s6, 0 }
 0x20a   :  { %1018 = shalt.err (%p1401_p5)  }
 0x20b   :  { %1020 = vsyncmov [#allocation3 + $0x3] }
 0x20e   :  { %s1021_s7 = vpop.sfrf %1020 }
 0x20f   :  { %p1402_p6 = scmp.ne.s32.totalorder %s1021_s7, 0 }
 0x211   :  { %1025 = shalt.err (%p1402_p6)  }
 0x212   :  { %1027 = vsyncmov [#allocation3 + $0x4] }
 0x215   :  { %s1028_s4 = vpop.sfrf %1027 }
 0x216   :  { %p1403_p7 = scmp.ne.s32.totalorder %s1028_s4, 0 }
 0x218   :  { %1032 = shalt.err (%p1403_p7)  }
 0x219   :  { %1034 = vsyncmov [#allocation3 + $0x5] }
 0x21c   :  { %s1035_s8 = vpop.sfrf %1034 }
 0x21d   :  { %p1404_p8 = scmp.ne.s32.totalorder %s1035_s8, 0 }
 0x21f   :  { %1039 = shalt.err (%p1404_p8)  }
 0x220   :  { %1041 = vsyncmov [#allocation3 + $0x6] }
 0x223   :  { %s1042_s9 = vpop.sfrf %1041 }
 0x224   :  { %p1405_p9 = scmp.ne.s32.totalorder %s1042_s9, 0 }
 0x226   :  { %1046 = shalt.err (%p1405_p9)  }
 0x227   :  { %1048 = vsyncmov [#allocation3 + $0x7] }
 0x22a   :  { %s1049_s10 = vpop.sfrf %1048 }
 0x22b   :  { %p1406_p10 = scmp.ne.s32.totalorder %s1049_s10, 0 }
 0x22d   :  { %1053 = shalt.err (%p1406_p10)  }
 0x22e   :  { %1055 = vsyncmov [#allocation3 + $0x8] }
 0x231   :  { %s1056_s11 = vpop.sfrf %1055 }
 0x232   :  { %p1407_p11 = scmp.ne.s32.totalorder %s1056_s11, 0 }
 0x234   :  { %1060 = shalt.err (%p1407_p11)  }
 0x235   :  { %1062 = vsyncmov [#allocation3 + $0x9] }
 0x238   :  { %s1063_s12 = vpop.sfrf %1062 }
 0x239   :  { %p1408_p12 = scmp.ne.s32.totalorder %s1063_s12, 0 }
 0x23b   :  { %1067 = shalt.err (%p1408_p12)  }
 0x23c   :  { %1069 = vsyncmov [#allocation3 + $0xa] }
 0x23f   :  { %s1070_s13 = vpop.sfrf %1069 }
 0x240   :  { %p1409_p13 = scmp.ne.s32.totalorder %s1070_s13, 0 }
 0x242   :  { %1074 = shalt.err (%p1409_p13)  }
 0x243   :  { %1076 = vsyncmov [#allocation3 + $0xb] }
 0x246   :  { %s1077_s14 = vpop.sfrf %1076 }
 0x247   :  { %p1410_p0 = scmp.ne.s32.totalorder %s1077_s14, 0 }
 0x249   :  { %1081 = shalt.err (%p1410_p0)  }
 0x24a   :  { %1083 = vsyncmov [#allocation3 + $0xc] }
 0x24d   :  { %s1084_s15 = vpop.sfrf %1083 }
 0x24e   :  { %p1411_p1 = scmp.ne.s32.totalorder %s1084_s15, 0 }
 0x250   :  { %1088 = shalt.err (%p1411_p1)  }
 0x251   :  { %1090 = vsyncmov [#allocation3 + $0xd] }
 0x254   :  { %s1091_s16 = vpop.sfrf %1090 }
 0x255   :  { %p1412_p2 = scmp.ne.s32.totalorder %s1091_s16, 0 }
 0x257   :  { %1095 = shalt.err (%p1412_p2)  }
 0x258   :  { %1097 = vsyncmov [#allocation3 + $0xe] }
 0x25b   :  { %s1098_s17 = vpop.sfrf %1097 }
 0x25c   :  { %p1413_p3 = scmp.ne.s32.totalorder %s1098_s17, 0 }
 0x25e   :  { %1102 = shalt.err (%p1413_p3)  }
 0x25f   :  { %1104 = vsyncmov [#allocation3 + $0xf] }
 0x262   :  { %s1105_s18 = vpop.sfrf %1104 }
 0x263   :  { %p1414_p4 = scmp.ne.s32.totalorder %s1105_s18, 0 }
 0x265   :  { %1109 = shalt.err (%p1414_p4)  }

</bundles_post_ra>
